<compile_context>
chip_gen: v7x
topology: tpu7x:2x2x1
jax: 0.10.0
libtpu: 0.0.40
codegen_flags: <defaults>
</compile_context>

<pallas_src>
import functools

import jax
import jax.numpy as jnp
from jax.experimental import pallas as pl
from jax.experimental.pallas import tpu as pltpu


def _controller_kernel(lat_ref, rec_ref, wl_ref, wr_ref, b_ref, o_ref, *, precision=None):
    # lat_ref: (TB, L)  rec_ref: (TB, R)
    # wl_ref:  (L, A)   wr_ref:  (R, A)   b_ref: (1, A)   o_ref: (TB, A)
    acc = jnp.dot(lat_ref[...], wl_ref[...],
                  preferred_element_type=jnp.float32, precision=precision)
    acc = acc + jnp.dot(rec_ref[...], wr_ref[...],
                        preferred_element_type=jnp.float32, precision=precision)
    o_ref[...] = (acc + b_ref[...]).astype(o_ref.dtype)


def _round_up(x, m):
    return ((x + m - 1) // m) * m


# Tile-size policy (rows). Activations lane-pad to 128 lanes, so each input or
# output tile costs ~tb * 128 * 4 B in VMEM, double-buffered. At the 8192-row
# cap that is ~25 MiB total -> fits the scoped VMEM limit on v5e/v6e/v7x.
_SINGLE_BLOCK_MAX_ROWS = 4096   # one grid step: traffic << per-step overhead
_TWO_WAY_MAX_ROWS = 16384       # two equal steps: one per TensorCore on v7x
_MAX_TILE_ROWS = 8192           # pipelined tiles for very large batches


def _pick_batch_tile(B):
    if B <= _SINGLE_BLOCK_MAX_ROWS:
        return B
    if B <= _TWO_WAY_MAX_ROWS:
        return min(_MAX_TILE_ROWS, _round_up(pl.cdiv(B, 2), 8))
    return _MAX_TILE_ROWS


def controller_forward(latents, recurrents, weight_t, bias, *,
                       cast_bf16=False, precision=None):
    """Pallas equivalent of Controller.forward(latents, recurrents).

    latents:    (B, LSIZE) float32
    recurrents: (B, RSIZE) float32
    weight_t:   (LSIZE + RSIZE, ASIZE) float32   (= PyTorch fc.weight.T)
    bias:       (ASIZE,) float32                 (= PyTorch fc.bias)
    returns:    (B, ASIZE) in latents.dtype

    cast_bf16:  optional throughput knob (halves activation HBM traffic);
                only use if ~1e-2 relative tolerance is acceptable.
    precision:  optional jax.lax.Precision for the dots (e.g. HIGHEST if
                closer-to-bit parity with a pure-f32 reference is required).
    """
    B, L = latents.shape
    Br, R = recurrents.shape
    assert Br == B, "latents and recurrents must share the batch dimension"
    F = L + R
    assert weight_t.shape[0] == F
    A = weight_t.shape[1]
    out_dtype = latents.dtype

    # One-time, tiny static split of the (F, A) weight — avoids any
    # concatenated activation buffer.
    w_lat = weight_t[:L]
    w_rec = weight_t[L:]
    bias2d = bias.reshape(1, A).astype(jnp.float32)

    if cast_bf16:
        latents = latents.astype(jnp.bfloat16)
        recurrents = recurrents.astype(jnp.bfloat16)
        w_lat = w_lat.astype(jnp.bfloat16)
        w_rec = w_rec.astype(jnp.bfloat16)

    tb = _pick_batch_tile(B)
    grid = (pl.cdiv(B, tb),)

    # VMEM budget with lane-padded tiles: (lat + rec) inputs + output, each
    # double-buffered, plus ~1 MiB slop for the resident weights/bias.
    act_bytes = jnp.dtype(latents.dtype).itemsize
    per_row = 128 * max(act_bytes, 4)
    vmem_est = 2 * 3 * tb * per_row + (1 << 20)
    vmem_limit = int(min(56 << 20, max(32 << 20, vmem_est)))

    kernel = functools.partial(_controller_kernel, precision=precision)

    out = pl.pallas_call(
        kernel,
        out_shape=jax.ShapeDtypeStruct((B, A), out_dtype),
        grid=grid,
        in_specs=[
            pl.BlockSpec((tb, L), lambda i: (i, 0)),   # latents tile
            pl.BlockSpec((tb, R), lambda i: (i, 0)),   # recurrents tile
            pl.BlockSpec((L, A), lambda i: (0, 0)),    # W_lat (VMEM-resident)
            pl.BlockSpec((R, A), lambda i: (0, 0)),    # W_rec (VMEM-resident)
            pl.BlockSpec((1, A), lambda i: (0, 0)),    # bias  (VMEM-resident)
        ],
        out_specs=pl.BlockSpec((tb, A), lambda i: (i, 0)),
        compiler_params=pltpu.CompilerParams(
            dimension_semantics=("parallel",),
            vmem_limit_bytes=vmem_limit,
        ),
        cost_estimate=pl.CostEstimate(
            flops=2 * B * F * A,
            transcendentals=0,
            bytes_accessed=act_bytes * (B * F + F * A) + 4 * (A + B * A),
        ),
    )(latents, recurrents, w_lat, w_rec, bias2d)
    return out


def _reference(latents, recurrents, weight_t, bias):
    return jnp.concatenate([latents, recurrents], axis=1) @ weight_t + bias


if __name__ == "__main__":
    LSIZE, RSIZE, ASIZE = 32, 64, 8
    fan_in = LSIZE + RSIZE

    key = jax.random.PRNGKey(0)
    k_w, k_b, k_lat, k_rec, k_lat2, k_rec2 = jax.random.split(key, 6)

    # Deterministic params mimicking nn.Linear's uniform(-1/sqrt(fan_in), 1/sqrt(fan_in))
    bound = 1.0 / jnp.sqrt(jnp.float32(fan_in))
    weight_t = jax.random.uniform(
        k_w, (fan_in, ASIZE), dtype=jnp.float32, minval=-bound, maxval=bound
    )
    bias = jax.random.uniform(
        k_b, (ASIZE,), dtype=jnp.float32, minval=-bound, maxval=bound
    )

    # Small-shape case matching the module docstring (single full-batch block).
    B = 2
    latents = jax.random.normal(k_lat, (B, LSIZE), dtype=jnp.float32)
    recurrents = jax.random.normal(k_rec, (B, RSIZE), dtype=jnp.float32)

    out = controller_forward(latents, recurrents, weight_t, bias)
    out = jax.block_until_ready(out)
    ref = _reference(latents, recurrents, weight_t, bias)
    assert out.shape == (B, ASIZE)
    assert jnp.allclose(out, ref, atol=1e-4, rtol=1e-4)

    # Larger batch: exercises the 2-way "parallel" split (one tile per
    # TensorCore on v7x; two cheap steps elsewhere).
    B2 = 6000
    latents2 = jax.random.normal(k_lat2, (B2, LSIZE), dtype=jnp.float32)
    recurrents2 = jax.random.normal(k_rec2, (B2, RSIZE), dtype=jnp.float32)

    out2 = controller_forward(latents2, recurrents2, weight_t, bias)
    out2 = jax.block_until_ready(out2)
    ref2 = _reference(latents2, recurrents2, weight_t, bias)
    assert out2.shape == (B2, ASIZE)
    assert jnp.allclose(out2, ref2, atol=1e-4, rtol=1e-4)

    print("KERNEL_OK")
</pallas_src>

<mosaic_0001>
module attributes {stable_mosaic.version = 11 : i64} {
  func.func @_controller_kernel(%arg0: i32, %arg1: memref<2x32xf32, #tpu.memory_space<vmem>>, %arg2: memref<2x64xf32, #tpu.memory_space<vmem>>, %arg3: memref<32x8xf32, #tpu.memory_space<vmem>>, %arg4: memref<64x8xf32, #tpu.memory_space<vmem>>, %arg5: memref<1x8xf32, #tpu.memory_space<vmem>>, %arg6: memref<2x8xf32, #tpu.memory_space<vmem>>) attributes {dimension_semantics = [#tpu.dimension_semantics<parallel>], iteration_bounds = array<i64: 1>, scalar_prefetch = 0 : i64, scratch_operands = 0 : i64, tpu.core_type = #tpu.core_type<tc>, window_params = [{transform_indices = @transform_0, window_bounds = array<i64: 2, 32>}, {transform_indices = @transform_1, window_bounds = array<i64: 2, 64>}, {pipeline_mode = #tpu.pipeline_mode<synchronous>, transform_indices = @transform_2, window_bounds = array<i64: 32, 8>}, {pipeline_mode = #tpu.pipeline_mode<synchronous>, transform_indices = @transform_3, window_bounds = array<i64: 64, 8>}, {pipeline_mode = #tpu.pipeline_mode<synchronous>, transform_indices = @transform_4, window_bounds = array<i64: 1, 8>}, {transform_indices = @transform_5, window_bounds = array<i64: 2, 8>}]} {
    %c0 = arith.constant 0 : index
    %c0_0 = arith.constant 0 : index
    %0 = vector.load %arg1[%c0, %c0_0] : memref<2x32xf32, #tpu.memory_space<vmem>>, vector<2x32xf32>
    %c0_1 = arith.constant 0 : index
    %c0_2 = arith.constant 0 : index
    %1 = vector.load %arg3[%c0_1, %c0_2] : memref<32x8xf32, #tpu.memory_space<vmem>>, vector<32x8xf32>
    %cst = arith.constant dense<0.000000e+00> : vector<2x8xf32>
    %2 = tpu.matmul %0, %1, %cst {dimension_numbers = #tpu.dot_dimension_numbers<[1], [0], [0], [1], [0, 0, 1, 1], [], []>} : vector<2x32xf32>, vector<32x8xf32>, vector<2x8xf32> -> vector<2x8xf32>
    %c0_3 = arith.constant 0 : index
    %c0_4 = arith.constant 0 : index
    %3 = vector.load %arg2[%c0_3, %c0_4] : memref<2x64xf32, #tpu.memory_space<vmem>>, vector<2x64xf32>
    %c0_5 = arith.constant 0 : index
    %c0_6 = arith.constant 0 : index
    %4 = vector.load %arg4[%c0_5, %c0_6] : memref<64x8xf32, #tpu.memory_space<vmem>>, vector<64x8xf32>
    %cst_7 = arith.constant dense<0.000000e+00> : vector<2x8xf32>
    %5 = tpu.matmul %3, %4, %cst_7 {dimension_numbers = #tpu.dot_dimension_numbers<[1], [0], [0], [1], [0, 0, 1, 1], [], []>} : vector<2x64xf32>, vector<64x8xf32>, vector<2x8xf32> -> vector<2x8xf32>
    %6 = arith.addf %2, %5 : vector<2x8xf32>
    %c0_8 = arith.constant 0 : index
    %c0_9 = arith.constant 0 : index
    %7 = vector.load %arg5[%c0_8, %c0_9] : memref<1x8xf32, #tpu.memory_space<vmem>>, vector<1x8xf32>
    %8 = vector.broadcast %7 : vector<1x8xf32> to vector<2x8xf32>
    %9 = arith.addf %6, %8 : vector<2x8xf32>
    %c0_10 = arith.constant 0 : index
    %c0_11 = arith.constant 0 : index
    %10 = vector.load %arg6[%c0_10, %c0_11] : memref<2x8xf32, #tpu.memory_space<vmem>>, vector<2x8xf32>
    tpu.vector_store %arg6[%c0_10, %c0_11], %9 {strides = array<i32>} : memref<2x8xf32, #tpu.memory_space<vmem>>, vector<2x8xf32>,
    return
  }
  func.func @transform_0(%arg0: i32) -> (i32, i32) {
    %c0_i32 = arith.constant 0 : i32
    %c0_i32_0 = arith.constant 0 : i32
    return %arg0, %c0_i32 : i32, i32
  }
  func.func @transform_1(%arg0: i32) -> (i32, i32) {
    %c0_i32 = arith.constant 0 : i32
    %c0_i32_0 = arith.constant 0 : i32
    return %arg0, %c0_i32 : i32, i32
  }
  func.func @transform_2(%arg0: i32) -> (i32, i32) {
    %c0_i32 = arith.constant 0 : i32
    %c0_i32_0 = arith.constant 0 : i32
    %c0_i32_1 = arith.constant 0 : i32
    return %c0_i32, %c0_i32_0 : i32, i32
  }
  func.func @transform_3(%arg0: i32) -> (i32, i32) {
    %c0_i32 = arith.constant 0 : i32
    %c0_i32_0 = arith.constant 0 : i32
    %c0_i32_1 = arith.constant 0 : i32
    return %c0_i32, %c0_i32_0 : i32, i32
  }
  func.func @transform_4(%arg0: i32) -> (i32, i32) {
    %c0_i32 = arith.constant 0 : i32
    %c0_i32_0 = arith.constant 0 : i32
    %c0_i32_1 = arith.constant 0 : i32
    return %c0_i32, %c0_i32_0 : i32, i32
  }
  func.func @transform_5(%arg0: i32) -> (i32, i32) {
    %c0_i32 = arith.constant 0 : i32
    %c0_i32_0 = arith.constant 0 : i32
    return %arg0, %c0_i32 : i32, i32
  }
}

</mosaic_0001>

<bundles_post_ra>
// kernel: tpu_custom_call.1
= control target key start
LH: loop header
LB: loop body
LE: loop exit
PB: predicated region body
PF: predicated region fallthrough
CT: control target
= control target key end

     0   :  { %v300_v3 = vmov 0.0|0.0   ;;  %vm301_vm0 = vmmov 0   ;;  %v302_v10 = vmov 0.0   ;;  %s391_s0 = inlined_call_operand.vmem [shape: f32[2,32], index: 0, kind: input, shape index: {}]   ;;  %s392_s1 = inlined_call_operand.vmem [shape: f32[2,64], index: 1, kind: input, shape index: {}]   ;;  %s393_s2 = inlined_call_operand.vmem [shape: f32[32,8], index: 2, kind: input, shape index: {}]   ;;  %s394_s3 = inlined_call_operand.vmem [shape: f32[64,8], index: 3, kind: input, shape index: {}]   ;;  %s395_s4 = inlined_call_operand.vmem [shape: f32[1,8], index: 4, kind: input, shape index: {}]   ;;  %s396_s5 = inlined_call_operand.hbm [shape: f32[2,8], index: 5, kind: output, shape index: {}]  }
   0x1   :  { %v27_v0 = vld [vmem:[%s394_s3] sm:$0xff]  ;;  %v28_v1 = vld [vmem:[%s394_s3 + $0x8] sm:$0xff]  ;;  %v29_v2 = vld [vmem:[%s394_s3 + $0x10] sm:$0xff]  ;;  %254 = vmatprep.subr.bf16.mxu0 %v300_v3  ;;  %266 = vmatprep.subr.bf16.mxu1 %v300_v3 }
   0x2   :  { %v255_v4 = vpack.c.bf16 %v28_v1, %v27_v0  ;;  %v30_v5 = vld [vmem:[%s394_s3 + $0x18] sm:$0xff]  ;;  %v22_v6 = vld [vmem:[%s393_s2] sm:$0xff]  ;;  %v23_v7 = vld [vmem:[%s393_s2 + $0x8] sm:$0xff]  ;;  %251 = vmatprep.mubr.msk.f32.mxu1 %vm301_vm0, %v302_v10  ;;  %240 = vmatprep.mubr.msk.f32.mxu0 %vm301_vm0, %v302_v10 }
   0x3   :  { %v267_v8 = vpack.c.bf16 %v23_v7, %v22_v6  ;;  %v24_v9 = vld [vmem:[%s393_s2 + $0x10] sm:$0xff]  ;;  %v258_v11 = vpack.c.bf16 %v30_v5, %v29_v2  ;;  %v25_v12 = vld [vmem:[%s393_s2 + $0x18] sm:$0xff]  ;;  %v31_v13 = vld [vmem:[%s394_s3 + $0x20] sm:$0xff] }
   0x4   :  { %256 = vmatpush3.bf16.msra.mxu0 %v255_v4  ;;  %v32_v14 = vld [vmem:[%s394_s3 + $0x28] sm:$0xff]  ;;  %v270_v15 = vpack.c.bf16 %v25_v12, %v24_v9 }
   0x5   :  { %257 = vmatprep.subr.bf16.mxu0 %v300_v3  ;;  %268 = vmatpush3.bf16.msra.mxu1 %v267_v8 }
   0x6   :  { %10 = vsyncpa [#allocation3], 0  ;;  %269 = vmatprep.subr.bf16.mxu1 %v300_v3  ;;  %v261_v16 = vpack.c.bf16 %v32_v14, %v31_v13  ;;  %v33_v17 = vld [vmem:[%s394_s3 + $0x30] sm:$0xff]  ;;  %v34_v18 = vld [vmem:[%s394_s3 + $0x38] sm:$0xff]  ;;  %vm109_vm1 = vcmask 261120   ;;  %vm35_vm2 = vcmask 523264  }
   0x7   :  { %v21_v19 = vld [vmem:[%s391_s0] sm:$0x3]  ;;  %v264_v20 = vpack.c.bf16 %v34_v18, %v33_v17  ;;  %s303_s0 = smov [#allocation2]   ;;  %vm191_vm3 = vcmask 58368  }
   0x8   :  { %259 = vmatpush3.bf16.msra.mxu0 %v258_v11  ;;  %v26_v21 = vld [vmem:[%s392_s1] sm:$0x3]  ;;  %s199_s21 = sshll.u32 %s303_s0, 4  ;;  %s200_s21 = int_to_ptr.vmem [resolvable:$true] %s199_s21 }
   0x9   :  { %260 = vmatprep.subr.bf16.mxu0 %v300_v3  ;;  %271 = vmatpush3.bf16.msra.mxu1 %v270_v15  ;;  %v209_v25 = vld [vmem:[%s395_s4] ss:$0 sm:$0xff]  ;;  %s276_s22 = scalar_lea.vmem %s200_s21, 32  ;;  %p281_p1 = scmp.lt.s32.totalorder %s200_s21, %s200_s21 }
   0xa   :  { %p277_p0 = scmp.ne.s32.totalorder %s200_s21, %s276_s22  ;;  %p282_p2 = scmp.lt.s32.totalorder %s276_s22, %s276_s22 }
   0xc   :  { %262 = vmatpush3.bf16.msra.mxu0 %v261_v16  ;;  %252 = vmatmul.mubr.msk.f32.vlgmr.msra.gmra.mrb[0].mxu1 %vm109_vm1, %v21_v19  ;;  %p283_p3 = por %p282_p2, %p281_p1 }
   0xd   :  { %263 = vmatprep.subr.bf16.mxu0 %v300_v3 }
   0xe   :  { %p284_p4 = pnand %p283_p3, %p277_p0 }
  0x10   :  { %265 = vmatpush3.bf16.msra.mxu0 %v264_v20 }
  0x13   :  { %241 = vmatmul.mubr.msk.f32.vlgmr.msra.gmra.mrb[0].mxu0 %vm35_vm2, %v26_v21 }
  0xdf   :  { %v179_v22 = vpop.f32.mrb[0].mxu1 }
  0xe0   :  { %v253_v23 = vpop.f32.mrb[1].mxu1 }
  0xe6   :  { %v105_v24 = vpop.f32.mrb[0].mxu0 }
  0xe7   :  { %v180_v26 = vadd.f32 %v179_v22, %v105_v24  ;;  %v242_v27 = vpop.f32.mrb[1].mxu0 }
  0xe9   :  { %v190_v28 = vadd.f32 %v209_v25, %v180_v26 }
  0xeb   :  { %192 = vst.msk [vmem:[#allocation2] sm:$0x3] %vm191_vm3, %v190_v28 }
  0xec   :  { %287 = shalt.err (!%p284_p4)
}
  0xed   :  { %s288_s24 = scalar_lea.hbm %s396_s5, 32 }
  0xee   :  { %p289_p5 = scmp.ne.s32.totalorder %s396_s5, %s288_s24  ;;  %p292_p6 = scmp.lt.u32.totalorder %s288_s24, %s396_s5 }
  0xf0   :  { %p294_p7 = pnand %p292_p6, %p289_p5 }
  0xf2   :  { %297 = shalt.err (!%p294_p7)
}
  0xf3   :  { %202 = dma.vmem_to_hbm [thread:$0]  %s200_s21, 32, %s396_s5, [#allocation3]  }
  0xf4   :  { %298 = dma.done.wait [#allocation3], 32  }
  0xf5   :  { %299 = vsyncadd [#allocation3], 4294967264 }
  0xf6   :  { %206 = vsyncpa [#allocation3], 1 }

</bundles_post_ra>
